<compile_context>
chip_gen: v6e
topology: v6e:2x2x1
jax: 0.10.0
libtpu: 0.0.40
codegen_flags: <defaults>
</compile_context>

<pallas_src>
import jax
import jax.numpy as jnp
from jax.experimental import pallas as pl
from jax.experimental.pallas import tpu as pltpu

EPS = 1e-5


def bottleneck_kernel(
    x_ref,      # (1, Ht, W, Cin)       bf16  current input tile
    xtop_ref,   # (1, 1, W, Cin)        bf16  row just above the tile (clamped)
    xbot_ref,   # (1, 1, W, Cin)        bf16  row just below the tile (clamped)
    w1_ref,     # (Cin, width)          bf16  conv1 (1x1) weight, bn1 scale folded
    b1_ref,     # (1, width)            f32   folded bn1 bias
    w2_ref,     # (3, 3*width, width)   bf16  conv2 (3x3) weight (rows = (kx,cin)), bn2 scale folded
    b2_ref,     # (1, width)            f32
    w3_ref,     # (width, Cout)         bf16  conv3 (1x1) weight, bn3 scale folded
    b3_ref,     # (1, Cout)             f32
    out_ref,    # (1, Ht, W, Cout)      bf16
    pad_ref,    # scratch (Ht+2, W, 3*width) bf16: im2col slab (kx taps on lanes)
):
    _, Ht, W, Cin = x_ref.shape
    width = w1_ref.shape[1]
    Cout = w3_ref.shape[1]

    hb = pl.program_id(1)
    n_hblk = pl.num_programs(1)

    # ---- conv1 (1x1) + folded bn1 + ReLU over tile AND both halo rows in one
    #      fat-M matmul ((Ht+2)*W rows). --------------------------------------
    x_full = jnp.concatenate(
        [xtop_ref[...].reshape(W, Cin),
         x_ref[...].reshape(Ht * W, Cin),
         xbot_ref[...].reshape(W, Cin)], axis=0)          # ((Ht+2)*W, Cin) bf16
    y1 = jnp.dot(x_full, w1_ref[...], preferred_element_type=jnp.float32)
    y1 = jnp.maximum(y1 + b1_ref[...], 0.0).astype(jnp.bfloat16)
    y1 = y1.reshape(Ht + 2, W, width)                     # row 0 / Ht+1 = halos

    # ---- build the im2col slab once:  slab[h, w, kx*width + c] = y1[h, w+kx-1, c]
    #      (zeros outside the image -> left/right conv padding). --------------
    zcol = jnp.zeros((Ht + 2, 1, width), jnp.bfloat16)
    left = jnp.concatenate([zcol, y1[:, :W - 1, :]], axis=1)   # kx = 0 tap
    right = jnp.concatenate([y1[:, 1:, :], zcol], axis=1)      # kx = 2 tap
    pad_ref[...] = jnp.concatenate([left, y1, right], axis=-1)

    # conv2 zero-pads at the image border: kill the halo row there.  This runs
    # every step it is needed on purpose (parallel grid axes / per-core scratch).
    @pl.when(hb == 0)
    def _():
        pad_ref[0:1, :, :] = jnp.zeros((1, W, 3 * width), jnp.bfloat16)

    @pl.when(hb == n_hblk - 1)
    def _():
        pad_ref[Ht + 1:Ht + 2, :, :] = jnp.zeros((1, W, 3 * width), jnp.bfloat16)

    # ---- conv2 (3x3, stride 1, pad 1): 3 fat-K matmuls; each ky input is a
    #      contiguous outer-dim slice of the slab (aligned, no concat). -------
    acc = jnp.zeros((Ht * W, width), jnp.float32)
    for ky in range(3):
        slab = pad_ref[ky:ky + Ht, :, :].reshape(Ht * W, 3 * width)
        acc = acc + jnp.dot(slab, w2_ref[ky], preferred_element_type=jnp.float32)
    y2 = jnp.maximum(acc + b2_ref[...], 0.0).astype(jnp.bfloat16)

    # ---- conv3 (1x1) + folded bn3 + residual add + ReLU (f32 accumulation). --
    y3 = jnp.dot(y2, w3_ref[...], preferred_element_type=jnp.float32)
    identity = x_ref[...].reshape(Ht * W, Cout).astype(jnp.float32)
    out = jnp.maximum(y3 + b3_ref[...] + identity, 0.0)
    out_ref[...] = out.reshape(1, Ht, W, Cout).astype(out_ref.dtype)


def _vmem_capacity_bytes():
    try:
        info = pltpu.get_tpu_info()
        cap = getattr(info, "vmem_capacity_bytes", None)
        if cap:
            return int(cap)
    except Exception:
        pass
    return 64 << 20  # conservative fallback (v7x per-TensorCore)


def _pick_h_tile(H, W, Cin):
    """Largest divisor of H whose bf16 (Ht, W, Cin) x-tile keeps the fused
    per-step footprint under ~40% of physical VMEM.  The footprint is roughly
    ~11x the x-tile bytes (double-buffered bf16 x/out blocks, im2col slab,
    f32 accumulators/intermediates).  Picking the largest fitting tile also
    keeps M = Ht*W large, which is the only lever to amortize MXU fill/drain
    for the narrow-N 1x1 convs."""
    cap = _vmem_capacity_bytes()
    target = max(int(0.4 * cap) // 11, W * Cin * 2)
    best = 1
    for ht in range(1, H + 1):
        if H % ht == 0 and ht * W * Cin * 2 <= target:
            best = ht
    return best


def bottleneck_forward_nhwc(x_nhwc, params, h_tile=None):
    """NHWC-native fused Bottleneck forward (eval-mode BN folded into the conv
    weights / a per-channel bias).  bf16 HBM in/out, f32 accumulation."""
    N, H, W, Cin = x_nhwc.shape
    (w1, g1, be1, m1, v1, w2, g2, be2, m2, v2, w3, g3, be3, m3, v3) = params
    width = w1.shape[0]
    Cout = w3.shape[0]
    assert w1.shape == (width, Cin, 1, 1)
    assert w2.shape == (width, width, 3, 3)
    assert w3.shape == (Cout, width, 1, 1)
    assert Cin == Cout, "default Bottleneck (downsample=None) needs inplanes == planes*4"

    # Fold BatchNorm running statistics (eval mode) into per-channel scale/bias;
    # fold the scale into the conv weights so only bias + ReLU remain in-kernel.
    def fold(g, b, m, v):
        s = (g * jax.lax.rsqrt(v + EPS)).astype(jnp.float32)
        return s, (b - m * s).reshape(1, -1).astype(jnp.float32)

    s1, b1 = fold(g1, be1, m1, v1)
    s2, b2 = fold(g2, be2, m2, v2)
    s3, b3 = fold(g3, be3, m3, v3)

    # Matmul-ready bf16 weights (output channels on the lane axis), BN-scaled.
    w1k = (jnp.transpose(w1[:, :, 0, 0], (1, 0)) * s1.reshape(1, -1)).astype(jnp.bfloat16)
    w2k = (jnp.transpose(w2, (2, 3, 1, 0)).reshape(3, 3 * width, width)      # rows=(kx,cin)
           * s2.reshape(1, 1, -1)).astype(jnp.bfloat16)
    w3k = (jnp.transpose(w3[:, :, 0, 0], (1, 0)) * s3.reshape(1, -1)).astype(jnp.bfloat16)

    x_bf16 = x_nhwc.astype(jnp.bfloat16)

    if h_tile is None:
        h_tile = _pick_h_tile(H, W, Cin)
    assert H % h_tile == 0, "h_tile must divide H"
    Ht = h_tile
    n_hblk = H // Ht

    full2 = lambda n, h: (0, 0)
    full3 = lambda n, h: (0, 0, 0)
    in_specs = [
        pl.BlockSpec((1, Ht, W, Cin), lambda n, h: (n, h, 0, 0)),
        # Halo rows: H-block size is 1, so the block index below IS the element
        # row index (clamped at the image border; the kernel zeroes it there).
        # Do NOT enlarge this block without rewriting the index_map.
        pl.BlockSpec((1, 1, W, Cin),
                     lambda n, h: (n, jnp.maximum(h * Ht - 1, 0), 0, 0)),
        pl.BlockSpec((1, 1, W, Cin),
                     lambda n, h: (n, jnp.minimum(h * Ht + Ht, H - 1), 0, 0)),
        pl.BlockSpec((Cin, width), full2),
        pl.BlockSpec((1, width), full2),
        pl.BlockSpec((3, 3 * width, width), full3),
        pl.BlockSpec((1, width), full2),
        pl.BlockSpec((width, Cout), full2),
        pl.BlockSpec((1, Cout), full2),
    ]
    out_spec = pl.BlockSpec((1, Ht, W, Cout), lambda n, h: (n, h, 0, 0))

    cap = _vmem_capacity_bytes()
    vmem_limit = int(0.75 * cap)   # v5e's default scoped limit (16 MiB) is too small

    flops = 2 * N * H * W * (Cin * width + 9 * width * width + width * Cout)
    bytes_accessed = (x_bf16.size * 2 + N * H * W * Cout * 2
                      + (w1k.size + w2k.size + w3k.size) * 2
                      + (b1.size + b2.size + b3.size) * 4)
    cost = pl.CostEstimate(flops=int(flops), transcendentals=0,
                           bytes_accessed=int(bytes_accessed))

    return pl.pallas_call(
        bottleneck_kernel,
        out_shape=jax.ShapeDtypeStruct((N, H, W, Cout), jnp.bfloat16),
        grid=(N, n_hblk),
        in_specs=in_specs,
        out_specs=out_spec,
        scratch_shapes=[pltpu.VMEM((Ht + 2, W, 3 * width), jnp.bfloat16)],
        compiler_params=pltpu.CompilerParams(
            dimension_semantics=("parallel", "parallel"),
            vmem_limit_bytes=vmem_limit),
        cost_estimate=cost,
    )(x_bf16, x_bf16, x_bf16, w1k, b1, w2k, b2, w3k, b3)


def bottleneck_forward(x_nchw, params, h_tile=None):
    """NCHW interface matching the PyTorch module.  In an NHWC-native model use
    bottleneck_forward_nhwc directly and skip both boundary transposes."""
    x_nhwc = jnp.transpose(x_nchw.astype(jnp.bfloat16), (0, 2, 3, 1))
    out = bottleneck_forward_nhwc(x_nhwc, params, h_tile)
    return jnp.transpose(out, (0, 3, 1, 2))


def bottleneck_reference_nhwc(x_nhwc_bf16, params):
    """Pure-JAX reference (eval-mode BN) mirroring the kernel's numerics:
    BN scale folded into bf16 conv weights, bf16 conv inputs, f32 accumulation,
    bias + residual add in f32."""
    (w1, g1, be1, m1, v1, w2, g2, be2, m2, v2, w3, g3, be3, m3, v3) = params

    def fold(g, b, m, v):
        s = g * jax.lax.rsqrt(v + EPS)
        return s, (b - m * s)

    def conv(x, w_torch, s, padding):
        k = (jnp.transpose(w_torch, (2, 3, 1, 0)) * s).astype(jnp.bfloat16)  # HWIO, scaled
        return jax.lax.conv_general_dilated(
            x.astype(jnp.bfloat16), k, window_strides=(1, 1), padding=padding,
            dimension_numbers=("NHWC", "HWIO", "NHWC"),
            preferred_element_type=jnp.float32)

    s1, c1 = fold(g1, be1, m1, v1)
    s2, c2 = fold(g2, be2, m2, v2)
    s3, c3 = fold(g3, be3, m3, v3)
    y = jax.nn.relu(conv(x_nhwc_bf16, w1, s1, "VALID") + c1)
    y = jax.nn.relu(conv(y, w2, s2, [(1, 1), (1, 1)]) + c2)
    y = conv(y, w3, s3, "VALID") + c3
    return jax.nn.relu(y + x_nhwc_bf16.astype(jnp.float32))


def make_params(key, inplanes, planes, base_width=64, groups=1):
    """Deterministic synthetic parameters with PyTorch-equivalent shapes
    (conv weights (out, in, kh, kw); BN gamma/beta/running_mean/running_var)."""
    expansion = 4
    width = int(planes * (base_width / 64.0)) * groups
    cout = planes * expansion
    ks = jax.random.split(key, 6)

    def bn_params(k, c):
        k1, k2, k3, k4 = jax.random.split(k, 4)
        gamma = 1.0 + 0.1 * jax.random.normal(k1, (c,), jnp.float32)
        beta = 0.1 * jax.random.normal(k2, (c,), jnp.float32)
        mean = 0.1 * jax.random.normal(k3, (c,), jnp.float32)
        var = 0.5 + jax.random.uniform(k4, (c,), jnp.float32)
        return gamma, beta, mean, var

    w1 = 0.1 * jax.random.normal(ks[0], (width, inplanes, 1, 1), jnp.float32)
    w2 = 0.1 * jax.random.normal(ks[1], (width, width, 3, 3), jnp.float32)
    w3 = 0.1 * jax.random.normal(ks[2], (cout, width, 1, 1), jnp.float32)
    g1, b1, m1, v1 = bn_params(ks[3], width)
    g2, b2, m2, v2 = bn_params(ks[4], width)
    g3, b3, m3, v3 = bn_params(ks[5], cout)
    return (w1, g1, b1, m1, v1, w2, g2, b2, m2, v2, w3, g3, b3, m3, v3)


if __name__ == "__main__":
    key = jax.random.PRNGKey(0)
    k_x, k_p = jax.random.split(key)

    # Small shapes consistent with the module: inplanes = planes * expansion,
    # lane-dense in/out channels (128), W a multiple of 8.
    N, planes, H, W = 2, 32, 16, 16
    inplanes = planes * 4  # 128

    x = jax.random.normal(k_x, (N, inplanes, H, W), jnp.float32)
    params = make_params(k_p, inplanes, planes)

    # h_tile=4 -> 4 H-tiles per image: exercises both border and interior halos.
    out = bottleneck_forward(x, params, h_tile=4)
    jax.block_until_ready(out)

    x_nhwc_bf16 = jnp.transpose(x.astype(jnp.bfloat16), (0, 2, 3, 1))
    ref = jnp.transpose(bottleneck_reference_nhwc(x_nhwc_bf16, params), (0, 3, 1, 2))

    assert out.shape == (N, inplanes, H, W)
    assert out.dtype == jnp.bfloat16
    assert bool(jnp.all(out >= 0.0))                      # final ReLU
    max_err = float(jnp.max(jnp.abs(out.astype(jnp.float32) - ref)))
    assert max_err < 5e-2, f"max abs error vs reference: {max_err}"
    print("KERNEL_OK")
</pallas_src>

<mosaic_0001>
module attributes {stable_mosaic.version = 11 : i64} {
  func.func @bottleneck_kernel(%arg0: i32, %arg1: i32, %arg2: memref<1x4x16x128xbf16, #tpu.memory_space<vmem>>, %arg3: memref<1x1x16x128xbf16, #tpu.memory_space<vmem>>, %arg4: memref<1x1x16x128xbf16, #tpu.memory_space<vmem>>, %arg5: memref<128x32xbf16, #tpu.memory_space<vmem>>, %arg6: memref<1x32xf32, #tpu.memory_space<vmem>>, %arg7: memref<3x96x32xbf16, #tpu.memory_space<vmem>>, %arg8: memref<1x32xf32, #tpu.memory_space<vmem>>, %arg9: memref<32x128xbf16, #tpu.memory_space<vmem>>, %arg10: memref<1x128xf32, #tpu.memory_space<vmem>>, %arg11: memref<1x4x16x128xbf16, #tpu.memory_space<vmem>>, %arg12: memref<6x16x96xbf16, #tpu.memory_space<vmem>>) attributes {dimension_semantics = [#tpu.dimension_semantics<parallel>, #tpu.dimension_semantics<parallel>], iteration_bounds = array<i64: 2, 4>, scalar_prefetch = 0 : i64, scratch_operands = 1 : i64, tpu.core_type = #tpu.core_type<tc>, window_params = [{transform_indices = @transform_0, window_bounds = array<i64: 1, 4, 16, 128>}, {transform_indices = @transform_1, window_bounds = array<i64: 1, 1, 16, 128>}, {transform_indices = @transform_2, window_bounds = array<i64: 1, 1, 16, 128>}, {pipeline_mode = #tpu.pipeline_mode<synchronous>, transform_indices = @transform_3, window_bounds = array<i64: 128, 32>}, {pipeline_mode = #tpu.pipeline_mode<synchronous>, transform_indices = @transform_4, window_bounds = array<i64: 1, 32>}, {pipeline_mode = #tpu.pipeline_mode<synchronous>, transform_indices = @transform_5, window_bounds = array<i64: 3, 96, 32>}, {pipeline_mode = #tpu.pipeline_mode<synchronous>, transform_indices = @transform_6, window_bounds = array<i64: 1, 32>}, {pipeline_mode = #tpu.pipeline_mode<synchronous>, transform_indices = @transform_7, window_bounds = array<i64: 32, 128>}, {pipeline_mode = #tpu.pipeline_mode<synchronous>, transform_indices = @transform_8, window_bounds = array<i64: 1, 128>}, {transform_indices = @transform_9, window_bounds = array<i64: 1, 4, 16, 128>}]} {
    %c0 = arith.constant 0 : index
    %c0_0 = arith.constant 0 : index
    %c0_1 = arith.constant 0 : index
    %c0_2 = arith.constant 0 : index
    %0 = vector.load %arg3[%c0, %c0_0, %c0_1, %c0_2] : memref<1x1x16x128xbf16, #tpu.memory_space<vmem>>, vector<1x1x16x128xbf16>
    %1 = vector.shape_cast %0 : vector<1x1x16x128xbf16> to vector<16x128xbf16>
    %c0_3 = arith.constant 0 : index
    %c0_4 = arith.constant 0 : index
    %c0_5 = arith.constant 0 : index
    %c0_6 = arith.constant 0 : index
    %2 = vector.load %arg2[%c0_3, %c0_4, %c0_5, %c0_6] : memref<1x4x16x128xbf16, #tpu.memory_space<vmem>>, vector<1x4x16x128xbf16>
    %3 = vector.shape_cast %2 : vector<1x4x16x128xbf16> to vector<64x128xbf16>
    %c0_7 = arith.constant 0 : index
    %c0_8 = arith.constant 0 : index
    %c0_9 = arith.constant 0 : index
    %c0_10 = arith.constant 0 : index
    %4 = vector.load %arg4[%c0_7, %c0_8, %c0_9, %c0_10] : memref<1x1x16x128xbf16, #tpu.memory_space<vmem>>, vector<1x1x16x128xbf16>
    %5 = vector.shape_cast %4 : vector<1x1x16x128xbf16> to vector<16x128xbf16>
    %6 = tpu.concatenate %1, %3, %5 in 0 : vector<16x128xbf16>, vector<64x128xbf16>, vector<16x128xbf16> -> vector<96x128xbf16>
    %c0_11 = arith.constant 0 : index
    %c0_12 = arith.constant 0 : index
    %7 = vector.load %arg5[%c0_11, %c0_12] : memref<128x32xbf16, #tpu.memory_space<vmem>>, vector<128x32xbf16>
    %cst = arith.constant dense<0.000000e+00> : vector<96x32xf32>
    %8 = tpu.matmul %6, %7, %cst {dimension_numbers = #tpu.dot_dimension_numbers<[1], [0], [0], [1], [0, 0, 1, 1], [], []>} : vector<96x128xbf16>, vector<128x32xbf16>, vector<96x32xf32> -> vector<96x32xf32>
    %c0_13 = arith.constant 0 : index
    %c0_14 = arith.constant 0 : index
    %9 = vector.load %arg6[%c0_13, %c0_14] : memref<1x32xf32, #tpu.memory_space<vmem>>, vector<1x32xf32>
    %10 = vector.broadcast %9 : vector<1x32xf32> to vector<96x32xf32>
    %11 = arith.addf %8, %10 : vector<96x32xf32>
    %cst_15 = arith.constant 0.000000e+00 : f32
    %12 = vector.broadcast %cst_15 : f32 to vector<96x32xf32>
    %13 = arith.maximumf %11, %12 : vector<96x32xf32>
    %14 = arith.truncf %13 : vector<96x32xf32> to vector<96x32xbf16>
    %15 = vector.shape_cast %14 : vector<96x32xbf16> to vector<6x16x32xbf16>
    %cst_16 = arith.constant 0.000000e+00 : bf16
    %16 = vector.broadcast %cst_16 : bf16 to vector<6x1x32xbf16>
    %17 = vector.extract_strided_slice %15 {offsets = [0, 0, 0], sizes = [6, 15, 32], strides = [1, 1, 1]} : vector<6x16x32xbf16> to vector<6x15x32xbf16>
    %18 = tpu.concatenate %16, %17 in 1 : vector<6x1x32xbf16>, vector<6x15x32xbf16> -> vector<6x16x32xbf16>
    %19 = vector.extract_strided_slice %15 {offsets = [0, 1, 0], sizes = [6, 15, 32], strides = [1, 1, 1]} : vector<6x16x32xbf16> to vector<6x15x32xbf16>
    %20 = tpu.concatenate %19, %16 in 1 : vector<6x15x32xbf16>, vector<6x1x32xbf16> -> vector<6x16x32xbf16>
    %21 = tpu.concatenate %18, %15, %20 in 2 : vector<6x16x32xbf16>, vector<6x16x32xbf16>, vector<6x16x32xbf16> -> vector<6x16x96xbf16>
    %c0_17 = arith.constant 0 : index
    %c0_18 = arith.constant 0 : index
    %c0_19 = arith.constant 0 : index
    %22 = vector.load %arg12[%c0_17, %c0_18, %c0_19] : memref<6x16x96xbf16, #tpu.memory_space<vmem>>, vector<6x16x96xbf16>
    tpu.vector_store %arg12[%c0_17, %c0_18, %c0_19], %21 {strides = array<i32>} : memref<6x16x96xbf16, #tpu.memory_space<vmem>>, vector<6x16x96xbf16>,
    %c0_i32 = arith.constant 0 : i32
    %23 = arith.cmpi eq, %arg1, %c0_i32 : i32
    %24 = arith.extui %23 : i1 to i32
    %c0_i32_20 = arith.constant 0 : i32
    %25 = arith.cmpi ne, %24, %c0_i32_20 : i32
    scf.if %25 {
      %cst_59 = arith.constant 0.000000e+00 : bf16
      %68 = vector.broadcast %cst_59 : bf16 to vector<1x16x96xbf16>
      %c0_60 = arith.constant 0 : index
      %c0_61 = arith.constant 0 : index
      %c0_62 = arith.constant 0 : index
      %69 = vector.load %arg12[%c0_60, %c0_61, %c0_62] : memref<6x16x96xbf16, #tpu.memory_space<vmem>>, vector<1x16x96xbf16>
      tpu.vector_store %arg12[%c0_60, %c0_61, %c0_62], %68 {strides = array<i32>} : memref<6x16x96xbf16, #tpu.memory_space<vmem>>, vector<1x16x96xbf16>,
    } else {
    }
    %c3_i32 = arith.constant 3 : i32
    %26 = arith.cmpi eq, %arg1, %c3_i32 : i32
    %27 = arith.extui %26 : i1 to i32
    %c0_i32_21 = arith.constant 0 : i32
    %28 = arith.cmpi ne, %27, %c0_i32_21 : i32
    scf.if %28 {
      %cst_59 = arith.constant 0.000000e+00 : bf16
      %68 = vector.broadcast %cst_59 : bf16 to vector<1x16x96xbf16>
      %c5 = arith.constant 5 : index
      %c0_60 = arith.constant 0 : index
      %c0_61 = arith.constant 0 : index
      %69 = vector.load %arg12[%c5, %c0_60, %c0_61] : memref<6x16x96xbf16, #tpu.memory_space<vmem>>, vector<1x16x96xbf16>
      tpu.vector_store %arg12[%c5, %c0_60, %c0_61], %68 {strides = array<i32>} : memref<6x16x96xbf16, #tpu.memory_space<vmem>>, vector<1x16x96xbf16>,
    } else {
    }
    %cst_22 = arith.constant 0.000000e+00 : f32
    %29 = vector.broadcast %cst_22 : f32 to vector<64x32xf32>
    %c0_23 = arith.constant 0 : index
    %c0_24 = arith.constant 0 : index
    %c0_25 = arith.constant 0 : index
    %30 = vector.load %arg12[%c0_23, %c0_24, %c0_25] : memref<6x16x96xbf16, #tpu.memory_space<vmem>>, vector<4x16x96xbf16>
    %31 = vector.shape_cast %30 : vector<4x16x96xbf16> to vector<64x96xbf16>
    %c0_26 = arith.constant 0 : index
    %c0_27 = arith.constant 0 : index
    %c0_28 = arith.constant 0 : index
    %32 = vector.load %arg7[%c0_26, %c0_27, %c0_28] : memref<3x96x32xbf16, #tpu.memory_space<vmem>>, vector<1x96x32xbf16>
    %33 = vector.shape_cast %32 : vector<1x96x32xbf16> to vector<96x32xbf16>
    %cst_29 = arith.constant dense<0.000000e+00> : vector<64x32xf32>
    %34 = tpu.matmul %31, %33, %cst_29 {dimension_numbers = #tpu.dot_dimension_numbers<[1], [0], [0], [1], [0, 0, 1, 1], [], []>} : vector<64x96xbf16>, vector<96x32xbf16>, vector<64x32xf32> -> vector<64x32xf32>
    %35 = arith.addf %29, %34 : vector<64x32xf32>
    %c1 = arith.constant 1 : index
    %c0_30 = arith.constant 0 : index
    %c0_31 = arith.constant 0 : index
    %36 = vector.load %arg12[%c1, %c0_30, %c0_31] : memref<6x16x96xbf16, #tpu.memory_space<vmem>>, vector<4x16x96xbf16>
    %37 = vector.shape_cast %36 : vector<4x16x96xbf16> to vector<64x96xbf16>
    %c1_32 = arith.constant 1 : index
    %c0_33 = arith.constant 0 : index
    %c0_34 = arith.constant 0 : index
    %38 = vector.load %arg7[%c1_32, %c0_33, %c0_34] : memref<3x96x32xbf16, #tpu.memory_space<vmem>>, vector<1x96x32xbf16>
    %39 = vector.shape_cast %38 : vector<1x96x32xbf16> to vector<96x32xbf16>
    %cst_35 = arith.constant dense<0.000000e+00> : vector<64x32xf32>
    %40 = tpu.matmul %37, %39, %cst_35 {dimension_numbers = #tpu.dot_dimension_numbers<[1], [0], [0], [1], [0, 0, 1, 1], [], []>} : vector<64x96xbf16>, vector<96x32xbf16>, vector<64x32xf32> -> vector<64x32xf32>
    %41 = arith.addf %35, %40 : vector<64x32xf32>
    %c2 = arith.constant 2 : index
    %c0_36 = arith.constant 0 : index
    %c0_37 = arith.constant 0 : index
    %42 = vector.load %arg12[%c2, %c0_36, %c0_37] : memref<6x16x96xbf16, #tpu.memory_space<vmem>>, vector<4x16x96xbf16>
    %43 = vector.shape_cast %42 : vector<4x16x96xbf16> to vector<64x96xbf16>
    %c2_38 = arith.constant 2 : index
    %c0_39 = arith.constant 0 : index
    %c0_40 = arith.constant 0 : index
    %44 = vector.load %arg7[%c2_38, %c0_39, %c0_40] : memref<3x96x32xbf16, #tpu.memory_space<vmem>>, vector<1x96x32xbf16>
    %45 = vector.shape_cast %44 : vector<1x96x32xbf16> to vector<96x32xbf16>
    %cst_41 = arith.constant dense<0.000000e+00> : vector<64x32xf32>
    %46 = tpu.matmul %43, %45, %cst_41 {dimension_numbers = #tpu.dot_dimension_numbers<[1], [0], [0], [1], [0, 0, 1, 1], [], []>} : vector<64x96xbf16>, vector<96x32xbf16>, vector<64x32xf32> -> vector<64x32xf32>
    %47 = arith.addf %41, %46 : vector<64x32xf32>
    %c0_42 = arith.constant 0 : index
    %c0_43 = arith.constant 0 : index
    %48 = vector.load %arg8[%c0_42, %c0_43] : memref<1x32xf32, #tpu.memory_space<vmem>>, vector<1x32xf32>
    %49 = vector.broadcast %48 : vector<1x32xf32> to vector<64x32xf32>
    %50 = arith.addf %47, %49 : vector<64x32xf32>
    %cst_44 = arith.constant 0.000000e+00 : f32
    %51 = vector.broadcast %cst_44 : f32 to vector<64x32xf32>
    %52 = arith.maximumf %50, %51 : vector<64x32xf32>
    %53 = arith.truncf %52 : vector<64x32xf32> to vector<64x32xbf16>
    %c0_45 = arith.constant 0 : index
    %c0_46 = arith.constant 0 : index
    %54 = vector.load %arg9[%c0_45, %c0_46] : memref<32x128xbf16, #tpu.memory_space<vmem>>, vector<32x128xbf16>
    %cst_47 = arith.constant dense<0.000000e+00> : vector<64x128xf32>
    %55 = tpu.matmul %53, %54, %cst_47 {dimension_numbers = #tpu.dot_dimension_numbers<[1], [0], [0], [1], [0, 0, 1, 1], [], []>} : vector<64x32xbf16>, vector<32x128xbf16>, vector<64x128xf32> -> vector<64x128xf32>
    %c0_48 = arith.constant 0 : index
    %c0_49 = arith.constant 0 : index
    %c0_50 = arith.constant 0 : index
    %c0_51 = arith.constant 0 : index
    %56 = vector.load %arg2[%c0_48, %c0_49, %c0_50, %c0_51] : memref<1x4x16x128xbf16, #tpu.memory_space<vmem>>, vector<1x4x16x128xbf16>
    %57 = vector.shape_cast %56 : vector<1x4x16x128xbf16> to vector<64x128xbf16>
    %58 = arith.extf %57 : vector<64x128xbf16> to vector<64x128xf32>
    %c0_52 = arith.constant 0 : index
    %c0_53 = arith.constant 0 : index
    %59 = vector.load %arg10[%c0_52, %c0_53] : memref<1x128xf32, #tpu.memory_space<vmem>>, vector<1x128xf32>
    %60 = vector.broadcast %59 : vector<1x128xf32> to vector<64x128xf32>
    %61 = arith.addf %55, %60 : vector<64x128xf32>
    %62 = arith.addf %61, %58 : vector<64x128xf32>
    %cst_54 = arith.constant 0.000000e+00 : f32
    %63 = vector.broadcast %cst_54 : f32 to vector<64x128xf32>
    %64 = arith.maximumf %62, %63 : vector<64x128xf32>
    %65 = vector.shape_cast %64 : vector<64x128xf32> to vector<1x4x16x128xf32>
    %66 = arith.truncf %65 : vector<1x4x16x128xf32> to vector<1x4x16x128xbf16>
    %c0_55 = arith.constant 0 : index
    %c0_56 = arith.constant 0 : index
    %c0_57 = arith.constant 0 : index
    %c0_58 = arith.constant 0 : index
    %67 = vector.load %arg11[%c0_55, %c0_56, %c0_57, %c0_58] : memref<1x4x16x128xbf16, #tpu.memory_space<vmem>>, vector<1x4x16x128xbf16>
    tpu.vector_store %arg11[%c0_55, %c0_56, %c0_57, %c0_58], %66 {strides = array<i32>} : memref<1x4x16x128xbf16, #tpu.memory_space<vmem>>, vector<1x4x16x128xbf16>,
    return
  }
  func.func @transform_0(%arg0: i32, %arg1: i32) -> (i32, i32, i32, i32) {
    %c0_i32 = arith.constant 0 : i32
    %c0_i32_0 = arith.constant 0 : i32
    %c0_i32_1 = arith.constant 0 : i32
    return %arg0, %arg1, %c0_i32, %c0_i32_0 : i32, i32, i32, i32
  }
  func.func @transform_1(%arg0: i32, %arg1: i32) -> (i32, i32, i32, i32) {
    %c4_i32 = arith.constant 4 : i32
    %0 = arith.muli %arg1, %c4_i32 : i32
    %c1_i32 = arith.constant 1 : i32
    %1 = arith.subi %0, %c1_i32 : i32
    %c0_i32 = arith.constant 0 : i32
    %2 = arith.maxsi %1, %c0_i32 : i32
    %c0_i32_0 = arith.constant 0 : i32
    %c0_i32_1 = arith.constant 0 : i32
    %c0_i32_2 = arith.constant 0 : i32
    return %arg0, %2, %c0_i32_0, %c0_i32_1 : i32, i32, i32, i32
  }
  func.func @transform_2(%arg0: i32, %arg1: i32) -> (i32, i32, i32, i32) {
    %c4_i32 = arith.constant 4 : i32
    %0 = arith.muli %arg1, %c4_i32 : i32
    %c4_i32_0 = arith.constant 4 : i32
    %1 = arith.addi %0, %c4_i32_0 : i32
    %c15_i32 = arith.constant 15 : i32
    %2 = arith.minsi %1, %c15_i32 : i32
    %c0_i32 = arith.constant 0 : i32
    %c0_i32_1 = arith.constant 0 : i32
    %c0_i32_2 = arith.constant 0 : i32
    return %arg0, %2, %c0_i32, %c0_i32_1 : i32, i32, i32, i32
  }
  func.func @transform_3(%arg0: i32, %arg1: i32) -> (i32, i32) {
    %c0_i32 = arith.constant 0 : i32
    %c0_i32_0 = arith.constant 0 : i32
    %c0_i32_1 = arith.constant 0 : i32
    return %c0_i32, %c0_i32_0 : i32, i32
  }
  func.func @transform_4(%arg0: i32, %arg1: i32) -> (i32, i32) {
    %c0_i32 = arith.constant 0 : i32
    %c0_i32_0 = arith.constant 0 : i32
    %c0_i32_1 = arith.constant 0 : i32
    return %c0_i32, %c0_i32_0 : i32, i32
  }
  func.func @transform_5(%arg0: i32, %arg1: i32) -> (i32, i32, i32) {
    %c0_i32 = arith.constant 0 : i32
    %c0_i32_0 = arith.constant 0 : i32
    %c0_i32_1 = arith.constant 0 : i32
    %c0_i32_2 = arith.constant 0 : i32
    return %c0_i32, %c0_i32_0, %c0_i32_1 : i32, i32, i32
  }
  func.func @transform_6(%arg0: i32, %arg1: i32) -> (i32, i32) {
    %c0_i32 = arith.constant 0 : i32
    %c0_i32_0 = arith.constant 0 : i32
    %c0_i32_1 = arith.constant 0 : i32
    return %c0_i32, %c0_i32_0 : i32, i32
  }
  func.func @transform_7(%arg0: i32, %arg1: i32) -> (i32, i32) {
    %c0_i32 = arith.constant 0 : i32
    %c0_i32_0 = arith.constant 0 : i32
    %c0_i32_1 = arith.constant 0 : i32
    return %c0_i32, %c0_i32_0 : i32, i32
  }
  func.func @transform_8(%arg0: i32, %arg1: i32) -> (i32, i32) {
    %c0_i32 = arith.constant 0 : i32
    %c0_i32_0 = arith.constant 0 : i32
    %c0_i32_1 = arith.constant 0 : i32
    return %c0_i32, %c0_i32_0 : i32, i32
  }
  func.func @transform_9(%arg0: i32, %arg1: i32) -> (i32, i32, i32, i32) {
    %c0_i32 = arith.constant 0 : i32
    %c0_i32_0 = arith.constant 0 : i32
    %c0_i32_1 = arith.constant 0 : i32
    return %arg0, %arg1, %c0_i32, %c0_i32_0 : i32, i32, i32, i32
  }
}

</mosaic_0001>

<bundles_post_ra>
// kernel: tpu_custom_call.1
= control target key start
LH: loop header
LB: loop body
LE: loop exit
PB: predicated region body
PF: predicated region fallthrough
CT: control target
= control target key end

     0   :  { %s3106_s0 = inlined_call_operand.vmem [shape: bf16[2,16,16,128], index: 0, kind: input, shape index: {}]   ;;  %s3107_s1 = inlined_call_operand.hbm [shape: bf16[2,16,16,128], index: 1, kind: input, shape index: {}]   ;;  %s3108_s2 = inlined_call_operand.hbm [shape: bf16[2,16,16,128], index: 2, kind: input, shape index: {}]   ;;  %s3109_s3 = inlined_call_operand.vmem [shape: bf16[128,32], index: 3, kind: input, shape index: {}]   ;;  %s3110_s4 = inlined_call_operand.vmem [shape: f32[1,32], index: 4, kind: input, shape index: {}]   ;;  %s3111_s5 = inlined_call_operand.vmem [shape: bf16[3,96,32], index: 5, kind: input, shape index: {}]   ;;  %s3112_s6 = inlined_call_operand.vmem [shape: f32[1,32], index: 6, kind: input, shape index: {}]   ;;  %s3113_s7 = inlined_call_operand.vmem [shape: bf16[32,128], index: 7, kind: input, shape index: {}]   ;;  %s3114_s8 = inlined_call_operand.vmem [shape: f32[1,128], index: 8, kind: input, shape index: {}]   ;;  %s3115_s9 = inlined_call_operand.hbm [shape: bf16[2,16,16,128], index: 9, kind: output, shape index: {}]  }
   0x1   :  { %3132 = sst [smem:[#allocation20_spill]] %s3106_s0 }
   0x2   :  { %3133 = sst [smem:[#allocation21_spill]] %s3109_s3 }
   0x3   :  { %3134 = sst [smem:[#allocation22_spill]] %s3110_s4 }
   0x4   :  { %3135 = sst [smem:[#allocation23_spill]] %s3111_s5 }
   0x5   :  { %3136 = sst [smem:[#allocation24_spill]] %s3112_s6 }
   0x6   :  { %3137 = sst [smem:[#allocation25_spill]] %s3113_s7 }
   0x7   :  { %3138 = sst [smem:[#allocation26_spill]] %s3114_s8 }
   0x8   :  { %3139 = sst [smem:[#allocation27_spill]] %s3115_s9 }
   0x9   :  { %14 = vsyncpa [#allocation4], 0 }
   0xa   :  { %16 = vsyncpa [#allocation4 + $0x1], 0 }
   0xb   :  { %17 = vsyncpa [#allocation7], 0 }
   0xc   :  { %19 = vsyncpa [#allocation7 + $0x1], 0 }
   0xd   :  { %20 = vsyncpa [#allocation5], 0 }
   0xe   :  { %22 = vsyncpa [#allocation5 + $0x1], 0  ;;  %s2547_s30 = smov 0   ;;  %s2549_s10 = smov 0  }
   0xf   :  { %s2551_s11 = smov 0   ;;  %s2553_s12 = smov 0  }
  0x10   :  { %s2555_s13 = smov 0   ;;  %s2557_s14 = smov 0  }
  0x11   :  { %s2559_s15 = smov 0   ;;  %s2561_s16 = smov 0  }
  0x12   :  { %s2563_s17 = smov 0   ;;  %s2565_s18 = smov 0  }
  0x13   :  { %s2567_s19 = smov 0   ;;  %s2569_s20 = smov 0  }
  0x14   :  { %s2571_s21 = smov 0   ;;  %s2573_s22 = smov 0  }
  0x15 LB: > { %3140 = sst [smem:[#allocation12_spill]] %s2433_s30  ;;  %s37_s25 = sadd.s32 1, %s2477_s20  ;;  %s2485_s22 = sphi %s2573_s22, %s28_s22   ;;  %s2481_s21 = sphi %s2571_s21, %s3200_s21   ;;  %s2477_s20 = sphi %s2569_s20, %s3199_s20   ;;  %s2473_s19 = sphi %s2567_s19, %s3198_s19   ;;  %s2469_s18 = sphi %s2565_s18, %s3197_s18   ;;  %s2465_s17 = sphi %s2563_s17, %s3196_s17   ;;  %s2461_s16 = sphi %s2561_s16, %s3195_s16   ;;  %s2457_s15 = sphi %s2559_s15, %s3194_s15   ;;  %s2453_s14 = sphi %s2557_s14, %s3193_s14   ;;  %s2449_s13 = sphi %s2555_s13, %s3192_s13   ;;  %s2445_s12 = sphi %s2553_s12, %s3191_s12   ;;  %s2441_s11 = sphi %s2551_s11, %s3185_s11   ;;  %s2437_s10 = sphi %s2549_s10, %s3190_s10   ;;  %s2433_s30 = sphi %s2547_s30, %s3189_s30  }
  0x16   : > { %3141 = sst [smem:[#allocation13_spill]] %s2441_s11  ;;  %s40_s26 = sadd.s32 1, %s2481_s21 }
  0x17   : > { %3142 = sst [smem:[#allocation14_spill]] %s2465_s17  ;;  %p38_p0 = scmp.ge.s32.totalorder %s37_s25, 4 }
  0x18   : > { %3143 = sst [smem:[#allocation15_spill]] %s2473_s19  ;;  %s3116_s27 = sshll.u32 %s2477_s20, 2 }
  0x19   : > { %s1752_s28 = sadd.s32 4294967295, %s3116_s27  ;;  %s85_s29 = sadd.s32 1, %s2465_s17 }
  0x1a   : > { %s3202_s25 = smov (%p38_p0, %s37_s25), 0  ;;  %s3204_s26 = smov (!%p38_p0, %s40_s26), %s2481_s21 }
  0x1b   : > { %p74_p1 = scmp.gt.s32.totalorder %s1752_s28, 0  ;;  %s3117_s24 = sshll.u32 %s3202_s25, 2 }
  0x1c   : > { %p42_p2 = scmp.ge.s32.totalorder %s3204_s26, 2  ;;  %s1754_s23 = sadd.s32 4294967295, %s3117_s24 }
  0x1d   : > { %s3206_s28 = smov (!%p74_p1, %s1752_s28), 0  ;;  %p78_p3 = scmp.gt.s32.totalorder %s1754_s23, 0 }
  0x1e   : > { %s3208_s26 = smov (%p42_p2, %s3204_s26), 0  ;;  %p92_p4 = scmp.ne.s32.totalorder %s2465_s17, %s2461_s16 }
  0x1f   : > { %3144 = sst [smem:[#allocation16_spill]] %s3208_s26  ;;  %s2639_s27 = ssub.s32 %s2481_s21, %s3208_s26 }
  0x20   : > { %p93_p5 = scmp.eq.s32.totalorder %s2485_s22, 0  ;;  %s3210_s23 = smov (!%p78_p3, %s1754_s23), 0 }
  0x21   : > { %p98_p7 = scmp.ne.s32.totalorder %s2461_s16, %s2457_s15  ;;  %s81_s9 = ssub.s32 %s3206_s28, %s3210_s23 }
  0x22   : > { %p2644_p6 = por %p93_p5, %p92_p4  ;;  %s3146_s8 = sadd.s32 4294967295, %s2485_s22  }
  0x23   : > { %p2653_p8 = scmp.eq.s32.totalorder %s3146_s8, 0  ;;  %s82_s6 = sor.u32 %s81_s9, %s2639_s27 }
  0x24   : > { %s271_s7 = ssub.s32 %s2477_s20, %s3202_s25  ;;  %p83_p9 = scmp.eq.s32.totalorder %s82_s6, 0 }
  0x25   : > { %p2662_p10 = por %p2653_p8, %p98_p7  ;;  %s272_s15 = sor.u32 %s271_s7, %s2639_s27 }
  0x26   : > { %s275_s23 = sadd.s32 1, %s2441_s11  ;;  %p273_p11 = scmp.eq.s32.totalorder %s272_s15, 0 }
  0x27   : > { %s2669_s4 = scalar_select %p83_p9, %s2465_s17, %s85_s29  }
  0x28   : > { %p285_p12 = scmp.ne.s32.totalorder %s2441_s11, %s2437_s10  ;;  %p286_p13 = scmp.eq.s32.totalorder %s3146_s8, 7 }
  0x29   : > { %3149 = sst [smem:[#allocation17_spill]] %s2669_s4  ;;  %p291_p0 = scmp.ne.s32.totalorder %s2437_s10, %s2433_s30 }
  0x2a   : > { %s2678_s6 = scalar_select %p273_p11, %s2441_s11, %s275_s23  }
  0x2b   : > { %p2680_p1 = por %p286_p13, %p285_p12  ;;  %s3152_s0 = sadd.s32 4294967294, %s2485_s22  }
  0x2c   : > { %3150 = sst [smem:[#allocation18_spill]] %s2678_s6  ;;  %p292_p2 = scmp.eq.s32.totalorder %s3152_s0, 7 }
  0x2d   : > { %s3151_s9 = scalar_select %p2680_p1, 1, 0 }
  0x2e   : > { %p3128_p3 = scmp.lt.s32.totalorder %s2485_s22, 8  ;;  %p2687_p4 = por %p292_p2, %p291_p0 }
  0x2f   : > { %s344_s29 = sand.u32 1, %s2465_s17   ;;  %s1762_s4 = sshll.u32 %s3206_s28, 1 }
  0x30   : > { %s3153_s7 = scalar_select %p2687_p4, 1, 0 }
  0x31   : > { %s1759_s15 = sshll.u32 %s344_s29, 3  ;;  %s1763_s8 = sshll.u32 %s2481_s21, 5 }
  0x32   : > { %3154 = sst [smem:[#allocation19_spill]] %s3153_s7  ;;  %s348_s3 = scalar_lea.vmem [#allocation3], %s1759_s15 }
  0x33   : > { %s361_s19 = sshll.u32 %s348_s3, 4  ;;  %s358_s23 = sadd.s32 %s1763_s8, %s1762_s4  ;;  %s362_s19 = int_to_ptr.vmem [resolvable:$true] %s361_s19 }
  0x34   : > { %s1764_s6 = sshll.u32 %s358_s23, 6  ;;  %p2700_p7 = pnand %p3128_p3, %p2644_p6 }
  0x35   : > { %s360_s17 = scalar_lea.hbm %s3107_s1, %s1764_s6  ;;  %s345_s7 = scalar_lea.sflag [#allocation4], %s344_s29 }
  0x36   : > { %p2283_p9 = pneg %p2700_p7  ;;  %s2294_s28 = scalar_lea.vmem %s362_s19, 128 }
  0x37   : > { %p2295_p11 = scmp.ne.s32.totalorder %s362_s19, %s2294_s28  ;;  %s2487_s3 = smov [#allocation3]  }
  0x38   : > { %s2299_s4 = sshll.u32 %s2487_s3, 4  ;;  %s2300_s4 = int_to_ptr.vmem [resolvable:$false] %s2299_s4 }
  0x39   : > { %p2297_p12 = pnand %p2295_p11, %p2283_p9  ;;  %s2301_s24 = scalar_lea.vmem %s2300_s4, 256 }
  0x3a   : > { %p2302_p6 = scmp.lt.s32.totalorder %s362_s19, %s2300_s4  ;;  %p2303_p0 = scmp.lt.s32.totalorder %s2301_s24, %s2294_s28 }
  0x3b   : > { %p2298_p13 = pneg %p2297_p12 }
  0x3c   : > { %p2304_p2 = por %p2303_p0, %p2302_p6 }
  0x3e   : > { %p2305_p3 = pnand %p2304_p2, %p2298_p13 }
  0x40   : > { %2308 = shalt.err (!%p2305_p3)
}
  0x41   : > { %s3129_s15 = smov 64   ;;  %s3130_s30 = smov 4  }
  0x42   : > { %2106 = dma.hbm_to_vmem [thread:$0]  (!%p2700_p7), %s360_s17, 128, %s362_s19, %s345_s7, %s3129_s15, %s3129_s15, %s3130_s30  }
  0x43   : > { %p1770_p3 = scmp.ge.s32.totalorder %s2485_s22, 1  ;;  %p396_p9 = scmp.lt.s32.totalorder %s2485_s22, 9 }
  0x44   : > { %s3157_s29 = sshll.u32 %s2477_s20, 2  ;;  %s3158_s0 = sshll.u32 %s3202_s25, 2 }
  0x45   : > { %p2716_p11 = pnand %p1770_p3, %p396_p9  ;;  %s109_s23 = sadd.s32 4, %s3157_s29 }
  0x46   : > { %p110_p12 = scmp.lt.s32.totalorder %s109_s23, 15  ;;  %s113_s28 = sadd.s32 4, %s3158_s0 }
  0x47   : > { %p114_p13 = scmp.lt.s32.totalorder %s113_s28, 15  ;;  %s121_s11 = sadd.s32 1, %s2453_s14 }
  0x48   : > { %s3212_s23 = smov (!%p110_p12, %s109_s23), 15  ;;  %p128_p7 = scmp.ne.s32.totalorder %s2453_s14, %s2449_s13 }
  0x49   : > { %s3214_s28 = smov (!%p114_p13, %s113_s28), 15  ;;  %p134_p6 = scmp.ne.s32.totalorder %s2449_s13, %s2445_s12 }
  0x4a   : > { %s117_s17 = ssub.s32 %s3212_s23, %s3214_s28  ;;  %s371_s19 = sand.u32 1, %s2453_s14  }
  0x4b   : > { %s118_s7 = sor.u32 %s117_s17, %s2639_s27  ;;  %p130_p0 = por %p128_p7, %p93_p5 }
  0x4c   : > { %p119_p2 = scmp.eq.s32.totalorder %s118_s7, 0  ;;  %p2735_p3 = por %p134_p6, %p2653_p8 }
  0x4d   : > { %s1765_s4 = sshll.u32 %s371_s19, 3  ;;  %s1767_s29 = sshll.u32 %s3212_s23, 1 }
  0x4e   : > { %s2740_s24 = scalar_select %p119_p2, %s2453_s14, %s121_s11  }
  0x4f   : > { %s385_s0 = sadd.s32 %s1767_s29, %s1763_s8  ;;  %s375_s15 = scalar_lea.vmem [#allocation6], %s1765_s4 }
  0x50   : > { %s388_s12 = sshll.u32 %s375_s15, 4  ;;  %s1769_s30 = sshll.u32 %s385_s0, 6  ;;  %s389_s12 = int_to_ptr.vmem [resolvable:$true] %s388_s12 }
  0x51   : > { %s387_s17 = scalar_lea.hbm %s3108_s2, %s1769_s30  ;;  %p3160_p5 = scmp.lt.s32.totalorder %s2485_s22, 8 }
  0x52   : > { %s372_s7 = scalar_lea.sflag [#allocation7], %s371_s19  ;;  %s2322_s23 = scalar_lea.vmem %s389_s12, 128 }
  0x53   : > { %p2749_p9 = pnand %p3160_p5, %p130_p0  ;;  %p2323_p12 = scmp.ne.s32.totalorder %s389_s12, %s2322_s23 }
  0x54   : > { %s2490_s8 = smov [#allocation6]  }
  0x55   : > { %p2311_p8 = pneg %p2749_p9  ;;  %s2327_s15 = sshll.u32 %s2490_s8, 4  ;;  %s2328_s15 = int_to_ptr.vmem [resolvable:$false] %s2327_s15 }
  0x56   : > { %s2329_s11 = scalar_lea.vmem %s2328_s15, 256  ;;  %p2330_p6 = scmp.lt.s32.totalorder %s389_s12, %s2328_s15 }
  0x57   : > { %p2325_p13 = pnand %p2323_p12, %p2311_p8  ;;  %p2331_p2 = scmp.lt.s32.totalorder %s2329_s11, %s2322_s23 }
  0x59   : > { %p2326_p7 = pneg %p2325_p13  ;;  %p2332_p4 = por %p2331_p2, %p2330_p6 }
  0x5b   : > { %p2333_p1 = pnand %p2332_p4, %p2326_p7 }
  0x5d   : > { %2336 = shalt.err (!%p2333_p1)
}
  0x5e   : > { %s3162_s30 = smov 4   ;;  %s3163_s4 = smov 64  }
  0x5f   : > { %2109 = dma.hbm_to_vmem [thread:$0]  (!%p2749_p9), %s387_s17, 128, %s389_s12, %s372_s7, %s3163_s4, %s3163_s4, %s3162_s30  }
  0x60   : > { %400 = sbr.rel (%p2716_p11) target bundleno = 1002 (0x3ea), region = 56  ;;  %s402_s19 = sand.u32 (!%p2716_p11), 1, %s2461_s16  }
  0x61   : > { %s2763_s29 = sshll.u32 (!%p2716_p11), %s402_s19, 3  ;;  %s403_s0 = scalar_lea.sflag (!%p2716_p11), [#allocation4], %s402_s19 }
  0x62   : > { %s406_s28 = scalar_lea.vmem (!%p2716_p11), [#allocation3], %s2763_s29 }
  0x65   : > { %2420 = dma.done.wait (%p2662_p10), %s403_s0, 128  }
  0x66   : > { %2422 = vsyncadd (%p2662_p10), %s403_s0, 4294967168  ;;  %s411_s27 = sand.u32 1, %s2449_s13  }
  0x67   : > { %s2771_s12 = sshll.u32 %s411_s27, 3  ;;  %s412_s6 = scalar_lea.sflag [#allocation7], %s411_s27 }
  0x68   : > { %s415_s17 = scalar_lea.vmem [#allocation6], %s2771_s12 }
  0x69   : > { %2424 = dma.done.wait (%p2735_p3), %s412_s6, 128  }
  0x6a   : > { %2426 = vsyncadd (%p2735_p3), %s412_s6, 4294967168  ;;  %s3164_s26 = sld [smem:[#allocation15_spill]]  ;;  %s462_s5 = sand.u32 1, %s2437_s10   ;;  %v2243_v4 = vld [vmem:[%s406_s28] sm:$0xff]   ;;  %v2248_v13 = vld [vmem:[%s415_s17] sm:$0xff]   ;;  %vm779_vm0 = vcmask 1047552  }
  0x6b   : > { %s1774_s7 = sshll.u32 %s2469_s18, 2  ;;  %s2782_s23 = sshll.u32 %s462_s5, 5  ;;  %2013 = vmatprep.mubr.bf16.mxu0 %v2243_v4  ;;  %vm780_vm1 = vsmask.f32 7424  ;;  %vm752_vm3 = vcmask 1040384   ;;  %vm824_vm6 = vcmask 261120  }
  0x6c   : > { %p468_p1 = scmp.lt.s32.totalorder %s1774_s7, 15  ;;  %s3165_s3 = sld [smem:[#allocation21_spill]]  ;;  %vm2836_vm2 = vmand %vm779_vm0, %vm780_vm1  ;;  %vm753_vm4 = vsmask.f32 256  ;;  %vm843_vm7 = vcmask 523264   ;;  %vm898_vm8 = vcmask 781312  }
  0x6d   : > { %s3166_s4 = sld [smem:[#allocation20_spill]]  ;;  %s2491_s12 = smov 32   ;;  %vm2874_vm5 = vmand %vm752_vm3, %vm753_vm4 }
  0x6e   : > { %s3218_s7 = smov (!%p468_p1, %s1774_s7), 15  ;;  %s3167_s30 = sld [smem:[#allocation22_spill]] }
  0x6f   : > { %s1775_s8 = sshll.u32 %s3218_s7, 1  ;;  %s2492_s17 = smov 64  }
  0x70   : > { %p466_p10 = scmp.lt.s32.totalorder %s3164_s26, 1  ;;  %p1805_p4 = scmp.ne.s32.totalorder %s2469_s18, 0 }
  0x72   : > { %s3216_s26 = smov (!%p466_p10, %s3164_s26), 1  ;;  %v2235_v0 = vld [vmem:[%s3165_s3 + $0x38] sm:$0xff]   ;;  %v2236_v1 = vld [vmem:[%s3165_s3 + $0x30] sm:$0xff]   ;;  %v2237_v2 = vld [vmem:[%s3165_s3 + $0x28] sm:$0xff]  }
  0x73   : > { %s1776_s15 = sshll.u32 %s3216_s26, 5  ;;  %1997 = vmatprep.subr.bf16.mxu0 %v2235_v0  ;;  %v2238_v3 = vld [vmem:[%s3165_s3 + $0x20] sm:$0xff]   ;;  %v2239_v5 = vld [vmem:[%s3165_s3 + $0x18] sm:$0xff]   ;;  %v2240_v6 = vld [vmem:[%s3165_s3 + $0x10] sm:$0xff]  }
  0x74   : > { %s472_s29 = sadd.s32 %s1776_s15, %s1775_s8  ;;  %1998 = vmatpush3.bf16.msra.mxu0 %v2235_v0  ;;  %v2241_v7 = vld [vmem:[%s3165_s3 + $0x8] sm:$0xff]   ;;  %v2242_v8 = vld [vmem:[%s3165_s3] sm:$0xff]  }
  0x75   : > { %1999 = vmatprep.subr.bf16.mxu0 %v2236_v1  ;;  %s1777_s6 = sshll.u32 %s472_s29, 2  ;;  %v2824_v15 = vld [vmem:[%s3167_s30] ss:$0 sm:$0xff] }
  0x76   : > { %s2801_s19 = scalar_lea.vmem %s3166_s4, %s1777_s6  ;;  %s2919_s4 = scalar_lea.vmem [#allocation8], %s2782_s23 }
  0x77   : > { %v2244_v9 = vld [vmem:[%s2801_s19] sm:$0xff]   ;;  %v2245_v10 = vld [vmem:[%s2801_s19 + $0x8] sm:$0xff]   ;;  %v2246_v11 = vld [vmem:[%s2801_s19 + $0x10] sm:$0xff]  }
  0x78   : > { %2000 = vmatpush3.bf16.msra.mxu0 %v2236_v1  ;;  %v2247_v12 = vld [vmem:[%s2801_s19 + $0x18] sm:$0xff]  }
  0x79   : > { %2001 = vmatprep.subr.bf16.mxu0 %v2237_v2 }
  0x7c   : > { %2002 = vmatpush3.bf16.msra.mxu0 %v2237_v2 }
  0x7d   : > { %2003 = vmatprep.subr.bf16.mxu0 %v2238_v3 }
  0x80   : > { %2004 = vmatpush3.bf16.msra.mxu0 %v2238_v3 }
  0x81   : > { %2005 = vmatprep.subr.bf16.mxu0 %v2239_v5 }
  0x84   : > { %2006 = vmatpush3.bf16.msra.mxu0 %v2239_v5 }
  0x85   : > { %2007 = vmatprep.subr.bf16.mxu0 %v2240_v6 }
  0x88   : > { %2008 = vmatpush3.bf16.msra.mxu0 %v2240_v6 }
  0x89   : > { %2009 = vmatprep.subr.bf16.mxu0 %v2241_v7 }
  0x8c   : > { %2010 = vmatpush3.bf16.msra.mxu0 %v2241_v7 }
  0x8d   : > { %2011 = vmatprep.subr.bf16.mxu0 %v2242_v8 }
  0x90   : > { %2012 = vmatpush3.bf16.msra.mxu0 %v2242_v8 }
  0x93   : > { %2014 = vmatmul.mubr.bf16.vlgmr.msra.gmra.mxu0 %v2244_v9 }
  0x94   : > { %2017 = vmatprep.mubr.bf16.mxu0 %v2245_v10 }
  0x9b   : > { %2018 = vmatmul.mubr.bf16.gmra.mxu0 %v2246_v11 }
  0x9c   : > { %2021 = vmatprep.mubr.bf16.mxu0 %v2247_v12 }
  0xa3   : > { %2022 = vmatmul.mubr.bf16.gmra.mxu0 %v2248_v13 }
 0x153   : > { %v2015_v14 = vpop.f32.mrf.mxu0 }
 0x154   : > { %v648_v17 = vadd.f32 %v2015_v14, %v2824_v15 }
 0x155   : > { %v639_v16 = vpop.f32.mrf.mxu0 }
 0x156   : > { %v640_v19 = vadd.f32 %v2824_v15, %v639_v16  ;;  %v688_v22 = vmax.f32 %v648_v17, 0.0 }
 0x157   : > { %v2016_v18 = vpop.f32.mrf.mxu0 }
 0x158   : > { %v651_v20 = vadd.f32 %v2016_v18, %v2824_v15  ;;  %v686_v26 = vmax.f32 %v640_v19, 0.0 }
 0x159   : > { %v642_v21 = vpop.f32.mrf.mxu0 }
 0x15a   : > { %v689_v23 = vmax.f32 %v651_v20, 0.0  ;;  %v643_v24 = vadd.f32 %v2824_v15, %v642_v21 }
 0x15b   : > { %v2019_v25 = vpop.f32.mrf.mxu0 }
 0x15c   : > { %v699_v27 = vpack.c.bf16 %v689_v23, %v688_v22  ;;  %v687_v28 = vmax.f32 %v643_v24, 0.0  ;;  %v664_v29 = vadd.f32 %v2019_v25, %v2824_v15 }
 0x15d   : > { %v655_v30 = vpop.f32.mrf.mxu0 }
 0x15e   : > { %v698_v31 = vpack.c.bf16 %v687_v28, %v686_v26  ;;  %796 = vrot.lane.b32.xlu0 %v699_v27, %s2491_s12  ;;  %v712_v32 = vshrl.u32 %v699_v27, 16  ;;  %v715_v34 = vshll.u32 %v699_v27, 16  ;;  %v656_v36 = vadd.f32 %v2824_v15, %v655_v30 }
 0x15f   : > { %v2020_v33 = vpop.f32.mrf.mxu0  ;;  %v692_v39 = vmax.f32 %v664_v29, 0.0 }
 0x160   : > { %v708_v35 = vshll.u32 %v698_v31, 16  ;;  %v667_v37 = vadd.f32 %v2020_v33, %v2824_v15  ;;  %v714_v38 = vrot.slane %v712_v32, 7  ;;  %v763_v41 = vrot.slane %v715_v34, 1 }
 0x161   : > { %v658_v40 = vpop.f32.mrf.mxu0  ;;  %v705_v42 = vshrl.u32 %v698_v31, 16  ;;  %v690_v51 = vmax.f32 %v656_v36, 0.0 }
 0x162   : > { %v693_v43 = vmax.f32 %v667_v37, 0.0  ;;  %v659_v44 = vadd.f32 %v2824_v15, %v658_v40  ;;  %794 = vrot.lane.b32.xlu0 %v698_v31, %s2491_s12  ;;  %v761_v46 = vrot.slane %v708_v35, 1  ;;  %v2840_v47 = vor.u32 %v715_v34, %v714_v38 }
 0x163   : > { %v2023_v48 = vpop.f32.mrf.mxu0  ;;  %v764_v49 = vor.u32 %v763_v41, %v712_v32  ;;  %v707_v50 = vrot.slane %v705_v42, 7 }
 0x164   : > { %v701_v52 = vpack.c.bf16 %v693_v43, %v692_v39  ;;  %v691_v53 = vmax.f32 %v659_v44, 0.0  ;;  %v762_v54 = vor.u32 %v761_v46, %v705_v42  ;;  %v680_v55 = vadd.f32 %v2023_v48, %v2824_v15 }
 0x165   : > { %v783_v56 = vsel %vm2836_vm2, %v764_v49, 0  ;;  %v671_v57 = vpop.f32.mrf.mxu0  ;;  %v2845_v58 = vor.u32 %v708_v35, %v707_v50  ;;  %v756_v39 = vsel %vm2874_vm5, 0, %v2840_v47 }
 0x166   : > { %v729_v59 = vshll.u32 %v701_v52, 16  ;;  %v700_v60 = vpack.c.bf16 %v691_v53, %v690_v51  ;;  %814 = vrot.lane.b32.xlu1 %v783_v56, %s2492_s17  ;;  %v672_v61 = vadd.f32 %v2824_v15, %v671_v57  ;;  %v782_v63 = vsel %vm2836_vm2, %v762_v54, 0 }
 0x167   : > { %v2024_v62 = vpop.f32.mrf.mxu0  ;;  %v726_v0 = vshrl.u32 %v701_v52, 16  ;;  %812 = vrot.lane.b32.xlu0 %v782_v63, %s2492_s17  ;;  %v696_v4 = vmax.f32 %v680_v55, 0.0  ;;  %v755_v42 = vsel %vm2874_vm5, 0, %v2845_v58 }
 0x168   : > { %v722_v1 = vshll.u32 %v700_v60, 16  ;;  %v683_v2 = vadd.f32 %v2024_v62, %v2824_v15  ;;  %v719_v3 = vshrl.u32 %v700_v60, 16  ;;  %v767_v7 = vrot.slane %v729_v59, 1 }
 0x169   : > { %v674_v5 = vpop.f32.mrf.mxu0  ;;  %v728_v6 = vrot.slane %v726_v0, 7  ;;  %v694_v12 = vmax.f32 %v672_v61, 0.0 }
 0x16a   : > { %v697_v8 = vmax.f32 %v683_v2, 0.0  ;;  %800 = vrot.lane.b32.xlu1 %v701_v52, %s2491_s12  ;;  %v675_v9 = vadd.f32 %v2824_v15, %v674_v5  ;;  %v721_v10 = vrot.slane %v719_v3, 7  ;;  %v765_v11 = vrot.slane %v722_v1, 1 }
 0x16b   : > { %v2855_v13 = vor.u32 %v729_v59, %v728_v6  ;;  %v768_v19 = vor.u32 %v767_v7, %v726_v0 }
 0x16c   : > { %v703_v14 = vpack.c.bf16 %v697_v8, %v696_v4  ;;  %v695_v16 = vmax.f32 %v675_v9, 0.0  ;;  %v766_v17 = vor.u32 %v765_v11, %v719_v3  ;;  %v724_v18 = vor.u32 %v722_v1, %v721_v10 }
 0x16d   : > { %v785_v26 = vsel %vm2836_vm2, %v768_v19, 0  ;;  %v758_v57 = vsel %vm2874_vm5, 0, %v2855_v13 }
 0x16e   : > { %v743_v20 = vshll.u32 %v703_v14, 16  ;;  %v702_v21 = vpack.c.bf16 %v695_v16, %v694_v12  ;;  %798 = vrot.lane.b32.xlu1 %v700_v60, %s2491_s12  ;;  %v784_v22 = vsel %vm2836_vm2, %v766_v17, 0  ;;  %v740_v23 = vshrl.u32 %v703_v14, 16 }
 0x16f   : > { %816 = vrot.lane.b32.xlu0 %v784_v22, %s2492_s17  ;;  %v757_v53 = vsel %vm2874_vm5, 0, %v724_v18 }
 0x170   : > { %v736_v15 = vshll.u32 %v702_v21, 16  ;;  %v733_v24 = vshrl.u32 %v702_v21, 16  ;;  %v742_v25 = vrot.slane %v740_v23, 7  ;;  %v771_v27 = vrot.slane %v743_v20, 1 }
 0x172   : > { %818 = vrot.lane.b32.xlu1 %v785_v26, %s2492_s17  ;;  %v735_v28 = vrot.slane %v733_v24, 7  ;;  %v769_v29 = vrot.slane %v736_v15, 1  ;;  %v2864_v30 = vor.u32 %v743_v20, %v742_v25  ;;  %v772_v33 = vor.u32 %v771_v27, %v740_v23 }
 0x173   : > { %802 = vrot.lane.b32.xlu0 %v702_v21, %s2491_s12 }
 0x174   : > { %v770_v31 = vor.u32 %v769_v29, %v733_v24  ;;  %v738_v32 = vor.u32 %v736_v15, %v735_v28  ;;  %v787_v35 = vsel %vm2836_vm2, %v772_v33, 0  ;;  %v760_v7 = vsel %vm2874_vm5, 0, %v2864_v30 }
 0x176   : > { %804 = vrot.lane.b32.xlu1 %v703_v14, %s2491_s12  ;;  %v786_v34 = vsel %vm2836_vm2, %v770_v31, 0  ;;  %v759_v2 = vsel %vm2874_vm5, 0, %v738_v32 }
 0x177   : > { %820 = vrot.lane.b32.xlu0 %v786_v34, %s2492_s17 }
 0x17a   : > { %822 = vrot.lane.b32.xlu1 %v787_v35, %s2492_s17 }
 0x1d0   : > { %v797_v36 = vpop.permute.xlu0 %796 }
 0x1d1   : > { %v830_v40 = vsel %vm824_vm6, %v756_v39, %v797_v36 }
 0x1d4   : > { %v795_v38 = vpop.permute.xlu0 %794 }
 0x1d5   : > { %v827_v44 = vsel %vm824_vm6, %v755_v42, %v795_v38 }
 0x1d8   : > { %v815_v41 = vpop.permute.xlu1 %814 }
 0x1d9   : > { %v847_v43 = vsel %vm843_vm7, %v830_v40, %v815_v41  ;;  %v813_v48 = vpop.permute.xlu0 %812 }
 0x1da   : > { %v1795_v45 = vcombine.low %v847_v43, %v847_v43  ;;  %v1796_v46 = vcombine.high %v847_v43, %v847_v43  ;;  %v845_v49 = vsel %vm843_vm7, %v827_v44, %v813_v48 }
 0x1db   : > { %v1793_v47 = vcombine.low %v845_v49, %v845_v49  ;;  %v1794_v50 = vcombine.high %v845_v49, %v845_v49 }
 0x1dc   : > { %901 = vst.msk [vmem:[#allocation2 + $0x8] sm:$0xf] %vm898_vm8, %v1795_v45  ;;  %902 = vst.msk [vmem:[#allocation2 + $0xc] sm:$0xf] %vm898_vm8, %v1796_v46  ;;  %v801_v51 = vpop.permute.xlu1 %800 }
 0x1dd   : > { %899 = vst.msk [vmem:[#allocation2] sm:$0xf] %vm898_vm8, %v1793_v47  ;;  %900 = vst.msk [vmem:[#allocation2 + $0x4] sm:$0xf] %vm898_vm8, %v1794_v50  ;;  %v836_v60 = vsel %vm824_vm6, %v758_v57, %v801_v51 }
 0x1e0   : > { %v799_v52 = vpop.permute.xlu1 %798 }
 0x1e1   : > { %v833_v54 = vsel %vm824_vm6, %v757_v53, %v799_v52  ;;  %v817_v55 = vpop.permute.xlu0 %816 }
 0x1e2   : > { %v849_v56 = vsel %vm843_vm7, %v833_v54, %v817_v55 }
 0x1e3   : > { %v1797_v58 = vcombine.low %v849_v56, %v849_v56  ;;  %v1798_v59 = vcombine.high %v849_v56, %v849_v56 }
 0x1e4   : > { %v819_v61 = vpop.permute.xlu1 %818 }
 0x1e5   : > { %903 = vst.msk [vmem:[#allocation2 + $0x10] sm:$0xf] %vm898_vm8, %v1797_v58  ;;  %904 = vst.msk [vmem:[#allocation2 + $0x14] sm:$0xf] %vm898_vm8, %v1798_v59  ;;  %v851_v62 = vsel %vm843_vm7, %v836_v60, %v819_v61  ;;  %v803_v63 = vpop.permute.xlu0 %802 }
 0x1e6   : > { %v1799_v0 = vcombine.low %v851_v62, %v851_v62  ;;  %v1800_v1 = vcombine.high %v851_v62, %v851_v62  ;;  %v839_v4 = vsel %vm824_vm6, %v759_v2, %v803_v63 }
 0x1e8   : > { %905 = vst.msk [vmem:[#allocation2 + $0x18] sm:$0xf] %vm898_vm8, %v1799_v0  ;;  %906 = vst.msk [vmem:[#allocation2 + $0x1c] sm:$0xf] %vm898_vm8, %v1800_v1  ;;  %v805_v3 = vpop.permute.xlu1 %804 }
 0x1e9   : > { %v821_v5 = vpop.permute.xlu0 %820  ;;  %v842_v10 = vsel %vm824_vm6, %v760_v7, %v805_v3 }
 0x1ea   : > { %v853_v6 = vsel %vm843_vm7, %v839_v4, %v821_v5 }
 0x1eb   : > { %v1801_v8 = vcombine.low %v853_v6, %v853_v6  ;;  %v1802_v9 = vcombine.high %v853_v6, %v853_v6 }
 0x1ec   : > { %v823_v11 = vpop.permute.xlu1 %822  ;;  %914 = sbr.rel (%p1805_p4) target bundleno = 499 (0x1f3), region = 68 }
 0x1ed   : > { %907 = vst.msk [vmem:[#allocation2 + $0x20] sm:$0xf] %vm898_vm8, %v1801_v8  ;;  %908 = vst.msk [vmem:[#allocation2 + $0x24] sm:$0xf] %vm898_vm8, %v1802_v9  ;;  %v855_v12 = vsel %vm843_vm7, %v842_v10, %v823_v11 }
 0x1ee   : > { %v1803_v13 = vcombine.low %v855_v12, %v855_v12  ;;  %v1804_v14 = vcombine.high %v855_v12, %v855_v12 }
 0x1f0   : > { %909 = vst.msk [vmem:[#allocation2 + $0x28] sm:$0xf] %vm898_vm8, %v1803_v13  ;;  %910 = vst.msk [vmem:[#allocation2 + $0x2c] sm:$0xf] %vm898_vm8, %v1804_v14 }
 0x1f1   : > { %v2493_v16 = vmov 0  }
 0x1f2   : > { %915 = vst.msk [vmem:[#allocation2] sm:$0xf] %vm898_vm8, %v2493_v16  ;;  %916 = vst.msk [vmem:[#allocation2 + $0x4] sm:$0xf] %vm898_vm8, %v2493_v16 }
 0x1f3 PF: > { %p1806_p11 = scmp.ne.s32.totalorder %s2469_s18, 3 }
 0x1f5   : > { %920 = sbr.rel (%p1806_p11) target bundleno = 508 (0x1fc), region = 72 }
 0x1fa   : > { %v2494_v17 = vmov 0  }
 0x1fb   : > { %922 = vst.msk [vmem:[#allocation2 + $0x28] sm:$0xf] %vm898_vm8, %v2494_v17  ;;  %923 = vst.msk [vmem:[#allocation2 + $0x2c] sm:$0xf] %vm898_vm8, %v2494_v17 }
 0x1fc PF: > { %s3172_s15 = sld [smem:[#allocation23_spill]]  ;;  %vm1022_vm9 = vcmask 785408   ;;  %v2256_v22 = vld [vmem:[#allocation2 + $0x8] sm:$0xff]   ;;  %v2257_v29 = vld [vmem:[#allocation2 + $0x10] sm:$0xff]   ;;  %v2264_v33 = vld [vmem:[#allocation2 + $0x18] sm:$0xff]   ;;  %s1904_s8 = sshll.u32 %s2469_s18, 3 }
 0x1fd   : > { %2037 = vmatprep.mubr.msk.bf16.mxu1 %vm1022_vm9, %v2256_v22  ;;  %v2270_v31 = vld [vmem:[#allocation2 + $0x10] sm:$0xff]   ;;  %v2265_v36 = vld [vmem:[#allocation2 + $0x20] sm:$0xff]   ;;  %v2272_v37 = vld [vmem:[#allocation2 + $0x18] sm:$0xff]   ;;  %s3174_s0 = sld [smem:[#allocation25_spill]]  ;;  %s1612_s28 = sshll.u32 %s2919_s4, 4  ;;  %s3024_s28 = int_to_ptr.vmem [resolvable:$true] %s1612_s28 }
 0x1fe   : > { %2077 = vmatprep.mubr.msk.bf16.mxu0 %vm1022_vm9, %v2270_v31  ;;  %v2275_v38 = vld [vmem:[#allocation2 + $0x20] sm:$0xff]   ;;  %v2274_v44 = vld [vmem:[#allocation2 + $0x8] sm:$0xff]   ;;  %v2277_v45 = vld [vmem:[#allocation2 + $0x10] sm:$0xff]   ;;  %s3175_s26 = sld [smem:[#allocation24_spill]]  ;;  %s3029_s11 = scalar_lea.sflag [#allocation5], %s462_s5 }
 0x1ff   : > { %v2273_v39 = vld [vmem:[#allocation2] sm:$0xff]   ;;  %v2278_v46 = vld [vmem:[#allocation2 + $0x18] sm:$0xff]   ;;  %s3176_s12 = sld [smem:[#allocation26_spill]]  ;;  %s2337_s30 = scalar_lea.vmem %s3024_s28, 512 }
 0x200   : > { %s3177_s23 = sld [smem:[#allocation15_spill]]  ;;  %p2338_p0 = scmp.ne.s32.totalorder %s3024_s28, %s2337_s30 }
 0x201   : > { %s3178_s7 = sld [smem:[#allocation27_spill]]  ;;  %p3179_p3 = scmp.ne.s32.totalorder %s3151_s9, 0 }
 0x202   : > { %s3173_s29 = smov %s3172_s15  ;;  %v2249_v18 = vld [vmem:[%s3172_s15 + $0x58] sm:$0xff]   ;;  %v2276_v42 = vld [vmem:[#allocation2 + $0x28] sm:$0xff]  }
 0x203   : > { %v2250_v19 = vld [vmem:[%s3173_s29 + $0x50] sm:$0xff]   ;;  %2025 = vmatprep.subr.bf16.mxu1 %v2249_v18  ;;  %v2251_v20 = vld [vmem:[%s3173_s29 + $0x48] sm:$0xff]   ;;  %v2252_v23 = vld [vmem:[%s3173_s29 + $0x40] sm:$0xff]   ;;  %p2339_p5 = pnand %p2338_p0, %p3179_p3 }
 0x204   : > { %2026 = vmatpush3.bf16.msra.mxu1 %v2249_v18  ;;  %v2255_v21 = vld [vmem:[%s3173_s29 + $0x88] sm:$0xff]   ;;  %v2259_v15 = vld [vmem:[%s3173_s29 + $0x80] sm:$0xff]   ;;  %v2253_v24 = vld [vmem:[%s3173_s29 + $0x38] sm:$0xff]  }
 0x205   : > { %2027 = vmatprep.subr.bf16.mxu1 %v2250_v19  ;;  %2065 = vmatprep.subr.bf16.mxu0 %v2255_v21  ;;  %v2261_v25 = vld [vmem:[%s3173_s29 + $0x78] sm:$0xff]   ;;  %v2263_v26 = vld [vmem:[%s3173_s29 + $0x70] sm:$0xff]   ;;  %v2267_v28 = vld [vmem:[%s3173_s29 + $0x68] sm:$0xff]   ;;  %p2340_p9 = pneg %p2339_p5 }
 0x206   : > { %2066 = vmatpush3.bf16.msra.mxu0 %v2255_v21  ;;  %v2254_v27 = vld [vmem:[%s3173_s29 + $0x30] sm:$0xff]   ;;  %v2258_v30 = vld [vmem:[%s3173_s29 + $0x28] sm:$0xff]   ;;  %v2269_v32 = vld [vmem:[%s3173_s29 + $0x60] sm:$0xff]   ;;  %s1892_s15 = sshll.u32 %s3177_s23, 5 }
 0x207   : > { %2067 = vmatprep.subr.bf16.mxu0 %v2259_v15  ;;  %v2260_v34 = vld [vmem:[%s3173_s29 + $0x20] sm:$0xff]   ;;  %v2262_v35 = vld [vmem:[%s3173_s29 + $0x18] sm:$0xff]   ;;  %v2266_v40 = vld [vmem:[%s3173_s29 + $0x10] sm:$0xff]  }
 0x208   : > { %2028 = vmatpush3.bf16.msra.mxu1 %v2250_v19  ;;  %v2268_v41 = vld [vmem:[%s3173_s29 + $0x8] sm:$0xff]   ;;  %v2271_v43 = vld [vmem:[%s3173_s29] sm:$0xff]  }
 0x209   : > { %2029 = vmatprep.subr.bf16.mxu1 %v2251_v20  ;;  %v2279_v48 = vld [vmem:[%s3174_s0 + $0x8] sm:$0xff]   ;;  %v2280_v49 = vld [vmem:[%s3174_s0] sm:$0xff]  }
 0x20a   : > { %2068 = vmatpush3.bf16.msra.mxu0 %v2259_v15  ;;  %v1873_v7 = vld [vmem:[%s3175_s26] ss:$0 sm:$0xff] }
 0x20b   : > { %2069 = vmatprep.subr.bf16.mxu0 %v2261_v25 }
 0x20c   : > { %2030 = vmatpush3.bf16.msra.mxu1 %v2251_v20 }
 0x20d   : > { %2031 = vmatprep.subr.bf16.mxu1 %v2252_v23 }
 0x20e   : > { %2070 = vmatpush3.bf16.msra.mxu0 %v2261_v25 }
 0x20f   : > { %2071 = vmatprep.subr.bf16.mxu0 %v2263_v26 }
 0x210   : > { %2032 = vmatpush3.bf16.msra.mxu1 %v2252_v23 }
 0x211   : > { %2033 = vmatprep.subr.bf16.mxu1 %v2253_v24 }
 0x212   : > { %2072 = vmatpush3.bf16.msra.mxu0 %v2263_v26 }
 0x213   : > { %2073 = vmatprep.subr.bf16.mxu0 %v2267_v28 }
 0x214   : > { %2034 = vmatpush3.bf16.msra.mxu1 %v2253_v24 }
 0x215   : > { %2035 = vmatprep.subr.bf16.mxu1 %v2254_v27 }
 0x216   : > { %2074 = vmatpush3.bf16.msra.mxu0 %v2267_v28 }
 0x217   : > { %2075 = vmatprep.subr.bf16.mxu0 %v2269_v32 }
 0x218   : > { %2036 = vmatpush3.bf16.msra.mxu1 %v2254_v27 }
 0x219   : > { %2045 = vmatprep.subr.bf16.mxu1 %v2258_v30 }
 0x21a   : > { %2076 = vmatpush3.bf16.msra.mxu0 %v2269_v32 }
 0x21b   : > { %2038 = vmatmul.mubr.msk.bf16.vlgmr.msra.gmra.mxu1 %vm1022_vm9, %v2257_v29 }
 0x21c   : > { %2046 = vmatpush3.bf16.msra.mxu1 %v2258_v30  ;;  %2041 = vmatprep.mubr.msk.bf16.mxu1 %vm1022_vm9, %v2264_v33 }
 0x21d   : > { %2047 = vmatprep.subr.bf16.mxu1 %v2260_v34  ;;  %2078 = vmatmul.mubr.msk.bf16.vlgmr.msra.gmra.mxu0 %vm1022_vm9, %v2272_v37 }
 0x21e   : > { %2081 = vmatprep.mubr.msk.bf16.mxu0 %vm1022_vm9, %v2275_v38 }
 0x220   : > { %2048 = vmatpush3.bf16.msra.mxu1 %v2260_v34 }
 0x221   : > { %2049 = vmatprep.subr.bf16.mxu1 %v2262_v35 }
 0x223   : > { %2042 = vmatmul.mubr.msk.bf16.gmra.mxu1 %vm1022_vm9, %v2265_v36 }
 0x224   : > { %2050 = vmatpush3.bf16.msra.mxu1 %v2262_v35  ;;  %2057 = vmatprep.mubr.msk.bf16.mxu1 %vm1022_vm9, %v2273_v39 }
 0x225   : > { %2051 = vmatprep.subr.bf16.mxu1 %v2266_v40  ;;  %2082 = vmatmul.mubr.msk.bf16.gmra.mxu0 %vm1022_vm9, %v2276_v42 }
 0x228   : > { %2052 = vmatpush3.bf16.msra.mxu1 %v2266_v40 }
 0x229   : > { %2053 = vmatprep.subr.bf16.mxu1 %v2268_v41 }
 0x22c   : > { %2054 = vmatpush3.bf16.msra.mxu1 %v2268_v41 }
 0x22d   : > { %2055 = vmatprep.subr.bf16.mxu1 %v2271_v43 }
 0x230   : > { %2056 = vmatpush3.bf16.msra.mxu1 %v2271_v43 }
 0x231   : > { %2085 = vmatprep.subr.bf16.mxu1 %v2279_v48 }
 0x233   : > { %2058 = vmatmul.mubr.msk.bf16.vlgmr.msra.gmra.mxu1 %vm1022_vm9, %v2274_v44 }
 0x234   : > { %2061 = vmatprep.mubr.msk.bf16.mxu1 %vm1022_vm9, %v2277_v45  ;;  %2086 = vmatpush3.bf16.msra.mxu1 %v2279_v48  ;;  %v1874_v48 = vld [vmem:[%s3176_s12] ss:$0 sm:$0xff]  ;;  %s2495_s12 = smov [#allocation8]  }
 0x235   : > { %2087 = vmatprep.subr.bf16.mxu1 %v2280_v49  ;;  %s2341_s23 = sshll.u32 %s2495_s12, 4  ;;  %s2342_s23 = int_to_ptr.vmem [resolvable:$false] %s2341_s23 }
 0x236   : > { %p2344_p8 = scmp.lt.s32.totalorder %s3024_s28, %s2342_s23 }
 0x238   : > { %2088 = vmatpush3.bf16.msra.mxu1 %v2280_v49 }
 0x23b   : > { %2062 = vmatmul.mubr.msk.bf16.gmra.mxu1 %vm1022_vm9, %v2278_v46  ;;  %v1941_v46 = vld [vmem:[%s2801_s19 + $0x8] sm:$0xff]  }
 0x2db   : > { %v2039_v47 = vpop.f32.mrf.mxu1 }
 0x2dd   : > { %v1069_v50 = vpop.f32.mrf.mxu1  ;;  %v2079_v54 = vpop.f32.mrf.mxu0 }
 0x2df   : > { %v2040_v51 = vpop.f32.mrf.mxu1  ;;  %v1357_v56 = vpop.f32.mrf.mxu0 }
 0x2e1   : > { %v1072_v52 = vpop.f32.mrf.mxu1  ;;  %v2080_v58 = vpop.f32.mrf.mxu0 }
 0x2e3   : > { %v2043_v53 = vpop.f32.mrf.mxu1  ;;  %v1360_v61 = vpop.f32.mrf.mxu0 }
 0x2e5   : > { %v1085_v55 = vpop.f32.mrf.mxu1  ;;  %v2083_v2 = vpop.f32.mrf.mxu0 }
 0x2e7   : > { %v2044_v57 = vpop.f32.mrf.mxu1  ;;  %v1373_v10 = vpop.f32.mrf.mxu0 }
 0x2e9   : > { %v1088_v59 = vpop.f32.mrf.mxu1  ;;  %v2084_v22 = vpop.f32.mrf.mxu0 }
 0x2eb   : > { %v1376_v33 = vpop.f32.mrf.mxu0 }
 0x2f3   : > { %v2059_v60 = vpop.f32.mrf.mxu1 }
 0x2f4   : > { %v1211_v62 = vadd.f32 %v2059_v60, %v2039_v47  ;;  %v1906_v47 = vld [vmem:[%s2801_s19] sm:$0xff]   ;;  %v1943_v60 = vld [vmem:[%s2801_s19 + $0x18] sm:$0xff]  }
 0x2f5   : > { %v1202_v63 = vpop.f32.mrf.mxu1 }
 0x2f6   : > { %v1203_v0 = vadd.f32 %v1202_v63, %v1069_v50  ;;  %v1390_v5 = vadd.f32 %v2079_v54, %v1211_v62  ;;  %v1911_v50 = vunpack.c.l.bf16 %v1941_v46 }
 0x2f7   : > { %v2060_v1 = vpop.f32.mrf.mxu1 }
 0x2f8   : > { %v1388_v3 = vadd.f32 %v1357_v56, %v1203_v0  ;;  %v1214_v4 = vadd.f32 %v2060_v1, %v2040_v51  ;;  %v1405_v16 = vadd.f32 %v1873_v7, %v1390_v5  ;;  %v1942_v1 = vld [vmem:[%s2801_s19 + $0x10] sm:$0xff]   ;;  %s1609_s19 = sadd.s32 %s1904_s8, %s1892_s15  ;;  %s2343_s8 = scalar_lea.vmem %s2342_s23, 1024 }
 0x2f9   : > { %v1205_v6 = vpop.f32.mrf.mxu1  ;;  %s1893_s18 = sshll.u32 %s1609_s19, 6  ;;  %p2345_p12 = scmp.lt.s32.totalorder %s2343_s8, %s2337_s30 }
 0x2fa   : > { %v1391_v8 = vadd.f32 %v2080_v58, %v1214_v4  ;;  %v1206_v9 = vadd.f32 %v1205_v6, %v1072_v52  ;;  %v1403_v12 = vadd.f32 %v1873_v7, %v1388_v3  ;;  %v1413_v26 = vmax.f32 %v1405_v16, 0.0  ;;  %s3021_s26 = scalar_lea.hbm %s3178_s7, %s1893_s18 }
 0x2fb   : > { %v2063_v11 = vpop.f32.mrf.mxu1  ;;  %p2346_p13 = por %p2345_p12, %p2344_p8 }
 0x2fc   : > { %v1406_v13 = vadd.f32 %v1873_v7, %v1391_v8  ;;  %v1389_v14 = vadd.f32 %v1360_v61, %v1206_v9  ;;  %v1227_v17 = vadd.f32 %v2063_v11, %v2043_v53  ;;  %v1411_v15 = vmax.f32 %v1403_v12, 0.0 }
 0x2fd   : > { %v1218_v18 = vpop.f32.mrf.mxu1  ;;  %v1907_v53 = vunpack.c.l.bf16 %v1906_v47  ;;  %v1915_v8 = vunpack.c.l.bf16 %v1942_v1  ;;  %p2347_p7 = pnand %p2346_p13, %p2340_p9 }
 0x2fe   : > { %v1404_v19 = vadd.f32 %v1873_v7, %v1389_v14  ;;  %v1219_v20 = vadd.f32 %v1218_v18, %v1085_v55  ;;  %v1414_v21 = vmax.f32 %v1406_v13, 0.0  ;;  %v1394_v27 = vadd.f32 %v2083_v2, %v1227_v17 }
 0x2ff   : > { %v2064_v23 = vpop.f32.mrf.mxu1  ;;  %v1912_v55 = vunpack.c.h.bf16 %v1941_v46  ;;  %v1919_v2 = vunpack.c.l.bf16 %v1943_v60 }
 0x300   : > { %v1412_v24 = vmax.f32 %v1404_v19, 0.0  ;;  %v1392_v25 = vadd.f32 %v1373_v10, %v1219_v20  ;;  %v1230_v28 = vadd.f32 %v2064_v23, %v2044_v57  ;;  %v1420_v32 = vpack.c.bf16 %v1414_v21, %v1413_v26 }
 0x301   : > { %v1221_v29 = vpop.f32.mrf.mxu1  ;;  %v1409_v37 = vadd.f32 %v1873_v7, %v1394_v27  ;;  %v1920_v10 = vunpack.c.h.bf16 %v1943_v60  ;;  %v1916_v20 = vunpack.c.h.bf16 %v1942_v1 }
 0x302   : > { %v1222_v30 = vadd.f32 %v1221_v29, %v1088_v59  ;;  %v1419_v31 = vpack.c.bf16 %v1412_v24, %v1411_v15  ;;  %v1395_v34 = vadd.f32 %v2084_v22, %v1230_v28  ;;  %v1407_v35 = vadd.f32 %v1873_v7, %v1392_v25 }
 0x303   : > { %v1417_v43 = vmax.f32 %v1409_v37, 0.0  ;;  %v1908_v59 = vunpack.c.h.bf16 %v1906_v47 }
 0x304   : > { %v1393_v36 = vadd.f32 %v1376_v33, %v1222_v30  ;;  %2089 = vmatprep.mubr.msk.bf16.mxu1 %vm824_vm6, %v1419_v31  ;;  %v1410_v38 = vadd.f32 %v1873_v7, %v1395_v34  ;;  %v1415_v41 = vmax.f32 %v1407_v35, 0.0 }
 0x305   : > { %2090 = vmatmul.mubr.msk.bf16.vlgmr.msra.gmra.mxu1 %vm824_vm6, %v1420_v32 }
 0x306   : > { %v1408_v39 = vadd.f32 %v1873_v7, %v1393_v36  ;;  %v1418_v40 = vmax.f32 %v1410_v38, 0.0 }
 0x308   : > { %v1416_v42 = vmax.f32 %v1408_v39, 0.0  ;;  %v1422_v45 = vpack.c.bf16 %v1418_v40, %v1417_v43 }
 0x30a   : > { %v1421_v44 = vpack.c.bf16 %v1416_v42, %v1415_v41 }
 0x30c   : > { %2093 = vmatprep.mubr.msk.bf16.mxu1 %vm824_vm6, %v1421_v44 }
 0x30d   : > { %2094 = vmatmul.mubr.msk.bf16.gmra.mxu1 %vm824_vm6, %v1422_v45 }
 0x3c5   : > { %v2091_v49 = vpop.f32.mrf.mxu1 }
 0x3c6   : > { %v1517_v51 = vadd.f32 %v2091_v49, %v1874_v48 }
 0x3c7   : > { %v1508_v52 = vpop.f32.mrf.mxu1 }
 0x3c8   : > { %v1509_v54 = vadd.f32 %v1874_v48, %v1508_v52  ;;  %v1541_v57 = vadd.f32 %v1911_v50, %v1517_v51 }
 0x3c9   : > { %v2092_v56 = vpop.f32.mrf.mxu1 }
 0x3ca   : > { %v1520_v58 = vadd.f32 %v2092_v56, %v1874_v48  ;;  %v1539_v62 = vadd.f32 %v1907_v53, %v1509_v54  ;;  %v1549_v4 = vmax.f32 %v1541_v57, 0.0 }
 0x3cb   : > { %v1511_v61 = vpop.f32.mrf.mxu1 }
 0x3cc   : > { %v1542_v63 = vadd.f32 %v1912_v55, %v1520_v58  ;;  %v1512_v0 = vadd.f32 %v1874_v48, %v1511_v61  ;;  %v1547_v11 = vmax.f32 %v1539_v62, 0.0 }
 0x3cd   : > { %v2095_v3 = vpop.f32.mrf.mxu1 }
 0x3ce   : > { %v1550_v5 = vmax.f32 %v1542_v63, 0.0  ;;  %v1540_v6 = vadd.f32 %v1908_v59, %v1512_v0  ;;  %v1533_v7 = vadd.f32 %v2095_v3, %v1874_v48 }
 0x3cf   : > { %v1524_v9 = vpop.f32.mrf.mxu1 }
 0x3d0   : > { %v1929_v12 = vpack.c.bf16 %v1550_v5, %v1549_v4  ;;  %v1548_v13 = vmax.f32 %v1540_v6, 0.0  ;;  %v1525_v14 = vadd.f32 %v1874_v48, %v1524_v9  ;;  %v1545_v18 = vadd.f32 %v1919_v2, %v1533_v7 }
 0x3d1   : > { %v2096_v16 = vpop.f32.mrf.mxu1 }
 0x3d2   : > { %1944 = vst [vmem:[%s2919_s4 + $0x8] sm:$0xff] %v1929_v12   ;;  %v1924_v17 = vpack.c.bf16 %v1548_v13, %v1547_v11  ;;  %v1536_v19 = vadd.f32 %v2096_v16, %v1874_v48  ;;  %v1543_v22 = vadd.f32 %v1915_v8, %v1525_v14  ;;  %v1553_v24 = vmax.f32 %v1545_v18, 0.0 }
 0x3d3   : > { %v1527_v21 = vpop.f32.mrf.mxu1 }
 0x3d4   : > { %1925 = vst [vmem:[%s2919_s4] sm:$0xff] %v1924_v17   ;;  %v1546_v23 = vadd.f32 %v1920_v10, %v1536_v19  ;;  %v1528_v15 = vadd.f32 %v1874_v48, %v1527_v21  ;;  %v1551_v27 = vmax.f32 %v1543_v22, 0.0 }
 0x3d6   : > { %v1554_v25 = vmax.f32 %v1546_v23, 0.0  ;;  %v1544_v26 = vadd.f32 %v1916_v20, %v1528_v15 }
 0x3d8   : > { %v1939_v28 = vpack.c.bf16 %v1554_v25, %v1553_v24  ;;  %v1552_v29 = vmax.f32 %v1544_v26, 0.0 }
 0x3da   : > { %1946 = vst [vmem:[%s2919_s4 + $0x18] sm:$0xff] %v1939_v28   ;;  %v1934_v30 = vpack.c.bf16 %v1552_v29, %v1551_v27 }
 0x3dc   : > { %1945 = vst [vmem:[%s2919_s4 + $0x10] sm:$0xff] %v1934_v30  }
 0x3dd   : > { %2350 = shalt.err (!%p2347_p7)
}
 0x3de   : > { %s2351_s5 = scalar_lea.hbm %s3021_s26, 512  ;;  %s2355_s19 = scalar_lea.hbm %s3178_s7, 4096 }
 0x3df   : > { %p2352_p6 = scmp.ne.s32.totalorder %s3021_s26, %s2351_s5  ;;  %p2356_p1 = scmp.lt.s32.totalorder %s3021_s26, %s3178_s7 }
 0x3e0   : > { %p2357_p4 = scmp.lt.s32.totalorder %s2355_s19, %s2351_s5 }
 0x3e1   : > { %p2353_p2 = pnand %p2352_p6, %p3179_p3 }
 0x3e2   : > { %p2358_p11 = por %p2357_p4, %p2356_p1 }
 0x3e3   : > { %p2354_p10 = pneg %p2353_p2 }
 0x3e5   : > { %p2359_p0 = pnand %p2358_p11, %p2354_p10 }
 0x3e7   : > { %2362 = shalt.err (!%p2359_p0)
}
 0x3e8   : > { %s2496_s6 = smov 4  }
 0x3e9   : > { %2101 = dma.vmem_to_hbm [thread:$0]  (%p3179_p3), %s3024_s28, 512, %s3021_s26, %s3029_s11, %s2492_s17, %s2492_s17, %s2496_s6  }
 0x3ea PF: > { %s3180_s30 = sld [smem:[#allocation12_spill]]  ;;  %p2115_p5 = scmp.ge.s32.totalorder %s2485_s22, 2 }
 0x3eb   : > { %s3181_s12 = sld [smem:[#allocation19_spill]] }
 0x3f0   : > { %s1627_s23 = sand.u32 1, %s3180_s30  }
 0x3f1   : > { %p3182_p9 = scmp.ne.s32.totalorder %s3181_s12, 0  ;;  %s1628_s8 = scalar_lea.sflag [#allocation5], %s1627_s23 }
 0x3f3   : > { %p2111_p8 = pnand %p2115_p5, %p3182_p9 }
 0x3f5   : > { %p2112_p12 = pneg %p2111_p8 }
 0x3f7   : > { %2428 = dma.done.wait (%p2112_p12), %s1628_s8, 512  }
 0x3f8   : > { %2430 = vsyncadd (%p2112_p12), %s1628_s8, 4294966784  ;;  %s28_s22 = sadd.s32 1, %s2485_s22   ;;  %s3184_s17 = sld [smem:[#allocation13_spill]] }
 0x3f9   : > { %p3059_p13 = scmp.ge.s32.totalorder %s28_s22, 10   ;;  %s3185_s11 = sld [smem:[#allocation18_spill]] }
 0x3fa   : > { %s3186_s28 = sld [smem:[#allocation14_spill]]  ;;  %s3189_s30 = smov %s2437_s10 }
 0x3fb   : > { %s3187_s26 = sld [smem:[#allocation17_spill]]  ;;  %s3191_s12 = smov %s2449_s13 }
 0x3fc   : > { %s3188_s5 = sld [smem:[#allocation16_spill]]  ;;  %s3192_s13 = smov %s2453_s14 }
 0x3fd   : > { %s3193_s14 = smov %s2740_s24  ;;  %s3194_s15 = smov %s2461_s16 }
 0x3fe   : > { %s3190_s10 = smov %s3184_s17  ;;  %s3197_s18 = smov %s2477_s20 }
 0x3ff   : > { %s3198_s19 = smov %s2481_s21  ;;  %s3199_s20 = smov %s3202_s25 }
 0x400   : > { %s3195_s16 = smov %s3186_s28  ;;  %27 = sbr.rel (!%p3059_p13) target bundleno = 21 (0x15), region = 130 }
 0x401   : > { %s3196_s17 = smov %s3187_s26 }
 0x402   : > { %s3200_s21 = smov %s3188_s5 }
 0x405   :  { %1633 = vsyncpa [#allocation4], 1 }
 0x406   :  { %1635 = vsyncpa [#allocation4 + $0x1], 1 }
 0x407   :  { %1636 = vsyncpa [#allocation7], 1 }
 0x408   :  { %1638 = vsyncpa [#allocation7 + $0x1], 1 }
 0x409   :  { %1639 = vsyncpa [#allocation5], 1 }
 0x40a   :  { %1641 = vsyncpa [#allocation5 + $0x1], 1 }

</bundles_post_ra>
